<compile_context>
chip_gen: v6e
topology: v6e:2x2x1
jax: 0.10.0
libtpu: 0.0.40
codegen_flags: <defaults>
</compile_context>

<pallas_src>
import functools

import jax
import jax.numpy as jnp
from jax.experimental import pallas as pl
from jax.experimental.pallas import tpu as pltpu


def tf_fusion_kernel(seq_len, x_ref, w_conv_ref, b_conv_ref,
                     w_fus_ref, b_fus_ref, o_ref):
    """Fused: [time|freq] conv (BN folded) + ReLU -> fusion Linear + ReLU.

    x_ref:      (Cin,   NLp)    batch*length folded on the lane axis (zero padded)
    w_conv_ref: (2*Cin, K*Cin)  stacked [time; freq] conv weights, contraction = (k, ci)
    b_conv_ref: (2*Cin, 1)      BN-folded conv biases
    w_fus_ref:  (Cout,  2*Cin)  fusion Linear weight
    b_fus_ref:  (Cout,  1)
    o_ref:      (Cout,  NLp)
    """
    x = x_ref[...]                                   # (Cin, NLp), native dtype
    rows, ncols = x.shape

    # Build the K=3 im2col operand in-registers: left/right neighbours within
    # each length-`seq_len` segment, zeroed at segment edges (padding=1 halo).
    # pltpu.roll only takes non-negative shifts -> shift by ncols-1 for "-1".
    col = jax.lax.broadcasted_iota(jnp.int32, (rows, ncols), 1)
    zero = jnp.zeros_like(x)
    x_lm1 = jnp.where(col % seq_len == 0, zero,
                      pltpu.roll(x, shift=1, axis=1))            # x[l-1]
    x_lp1 = jnp.where(col % seq_len == seq_len - 1, zero,
                      pltpu.roll(x, shift=ncols - 1, axis=1))    # x[l+1]
    x_col = jnp.concatenate([x_lm1, x, x_lp1], axis=0)           # (K*Cin, NLp)

    # Both branch convolutions (+ folded BatchNorm) in a single MXU matmul.
    h = jnp.dot(w_conv_ref[...], x_col, preferred_element_type=jnp.float32)
    h = jnp.maximum(h + b_conv_ref[...].astype(jnp.float32), 0.0)   # (2*Cin, NLp)

    # Per-position fusion Linear over channels + final ReLU.
    out = jnp.dot(w_fus_ref[...], h.astype(w_fus_ref.dtype),
                  preferred_element_type=jnp.float32)
    out = jnp.maximum(out + b_fus_ref[...].astype(jnp.float32), 0.0)
    o_ref[...] = out.astype(o_ref.dtype)


def time_frequency_fusion_block(x, p, *, eps=1e-5):
    """x: (N, 2C, L) real (or complex (N, C, L)); params dict p. Returns (N, 2C, L)."""
    if jnp.iscomplexobj(x):
        # torch.view_as_real(x).permute(0,3,1,2).flatten(1,2): [real_0..C-1, imag_0..C-1]
        x = jnp.concatenate([x.real, x.imag], axis=1)

    n, cin, length = x.shape                 # cin = 2*channels
    cboth = 2 * cin                          # concat of both branch outputs (4C)
    cout = p["w_fusion"].shape[0]            # 2*channels
    k_size = p["w_time"].shape[2]

    # ---- fold inference-mode BatchNorm into the conv weights / biases (tiny) ----
    # TODO(synk): training-mode BN (batch statistics) is not computed in-kernel.
    def fold(w, b, gamma, beta, mean, var):
        scale = gamma / jnp.sqrt(var + eps)
        return w * scale[:, None, None], (b - mean) * scale + beta

    wt, bt = fold(p["w_time"], p["b_time"], p["g_time"], p["be_time"],
                  p["m_time"], p["v_time"])
    wf, bf = fold(p["w_freq"], p["b_freq"], p["g_freq"], p["be_freq"],
                  p["m_freq"], p["v_freq"])

    w_conv = jnp.concatenate([wt, wf], axis=0)                        # (4C, 2C, K)
    w_conv = w_conv.transpose(0, 2, 1).reshape(cboth, k_size * cin)   # rows x (k*Cin+ci)
    b_conv = jnp.concatenate([bt, bf], axis=0).reshape(cboth, 1)
    w_fus = p["w_fusion"]                                             # (2C, 4C)
    b_fus = p["b_fusion"].reshape(cout, 1)

    # ---- fold (N, L) into one lane-dense column axis, pad to a multiple of 128 ----
    ncols = n * length
    ncols_p = max(128, ((ncols + 127) // 128) * 128)
    x2 = x.transpose(1, 0, 2).reshape(cin, ncols)          # layout plumbing (one pass)
    x2 = jnp.pad(x2, ((0, 0), (0, ncols_p - ncols)))

    out = pl.pallas_call(
        functools.partial(tf_fusion_kernel, length),
        out_shape=jax.ShapeDtypeStruct((cout, ncols_p), x.dtype),
        grid=(1,),
        in_specs=[
            pl.BlockSpec((cin, ncols_p), lambda i: (0, 0)),
            pl.BlockSpec((cboth, k_size * cin), lambda i: (0, 0)),
            pl.BlockSpec((cboth, 1), lambda i: (0, 0)),
            pl.BlockSpec((cout, cboth), lambda i: (0, 0)),
            pl.BlockSpec((cout, 1), lambda i: (0, 0)),
        ],
        out_specs=pl.BlockSpec((cout, ncols_p), lambda i: (0, 0)),
        compiler_params=pltpu.CompilerParams(dimension_semantics=("arbitrary",)),
    )(x2, w_conv, b_conv, w_fus, b_fus)

    return out[:, :ncols].reshape(cout, n, length).transpose(1, 0, 2)


def reference_forward(x, p, eps=1e-5):
    """Pure-JAX reference matching PyTorch (eval-mode BN) semantics."""
    def branch(w, b, g, be, m, v):
        y = jax.lax.conv_general_dilated(
            x, w, window_strides=(1,), padding=[(1, 1)],
            dimension_numbers=("NCH", "OIH", "NCH")) + b[None, :, None]
        y = (y - m[None, :, None]) / jnp.sqrt(v[None, :, None] + eps)
        y = y * g[None, :, None] + be[None, :, None]
        return jnp.maximum(y, 0.0)

    t = branch(p["w_time"], p["b_time"], p["g_time"], p["be_time"],
               p["m_time"], p["v_time"])
    f = branch(p["w_freq"], p["b_freq"], p["g_freq"], p["be_freq"],
               p["m_freq"], p["v_freq"])
    fused = jnp.concatenate([t, f], axis=1)                           # (N, 4C, L)
    out = jnp.einsum("oc,ncl->nol", p["w_fusion"], fused) + p["b_fusion"][None, :, None]
    return jnp.maximum(out, 0.0)


if __name__ == "__main__":
    channels, freq_dim = 4, 16        # freq_dim is unused by the module's forward
    batch, length = 2, 16
    c2, c4, k_size = 2 * channels, 4 * channels, 3

    keys = jax.random.split(jax.random.PRNGKey(0), 15)

    x = jax.random.normal(keys[0], (batch, c2, length), dtype=jnp.float32)

    def conv_init(kw, kb, co, ci, ks):
        bound = 1.0 / jnp.sqrt(ci * ks)
        w = jax.random.uniform(kw, (co, ci, ks), minval=-bound, maxval=bound,
                               dtype=jnp.float32)
        b = jax.random.uniform(kb, (co,), minval=-bound, maxval=bound,
                               dtype=jnp.float32)
        return w, b

    w_time, b_time = conv_init(keys[1], keys[2], c2, c2, k_size)
    w_freq, b_freq = conv_init(keys[3], keys[4], c2, c2, k_size)
    lin_bound = 1.0 / jnp.sqrt(c4)
    w_fusion = jax.random.uniform(keys[5], (c2, c4), minval=-lin_bound,
                                  maxval=lin_bound, dtype=jnp.float32)
    b_fusion = jax.random.uniform(keys[6], (c2,), minval=-lin_bound,
                                  maxval=lin_bound, dtype=jnp.float32)

    params = dict(
        w_time=w_time, b_time=b_time, w_freq=w_freq, b_freq=b_freq,
        w_fusion=w_fusion, b_fusion=b_fusion,
        # non-trivial inference-mode BatchNorm statistics / affine params
        g_time=jax.random.uniform(keys[7], (c2,), minval=0.5, maxval=1.5,
                                  dtype=jnp.float32),
        be_time=0.1 * jax.random.normal(keys[8], (c2,), dtype=jnp.float32),
        m_time=0.1 * jax.random.normal(keys[9], (c2,), dtype=jnp.float32),
        v_time=jax.random.uniform(keys[10], (c2,), minval=0.5, maxval=1.5,
                                  dtype=jnp.float32),
        g_freq=jax.random.uniform(keys[11], (c2,), minval=0.5, maxval=1.5,
                                  dtype=jnp.float32),
        be_freq=0.1 * jax.random.normal(keys[12], (c2,), dtype=jnp.float32),
        m_freq=0.1 * jax.random.normal(keys[13], (c2,), dtype=jnp.float32),
        v_freq=jax.random.uniform(keys[14], (c2,), minval=0.5, maxval=1.5,
                                  dtype=jnp.float32),
    )

    y = time_frequency_fusion_block(x, params)
    y = jax.block_until_ready(y)

    y_ref = reference_forward(x, params)
    assert y.shape == (batch, c2, length)
    assert jnp.allclose(y, y_ref, atol=1e-4, rtol=1e-4), \
        float(jnp.max(jnp.abs(y - y_ref)))

    print("KERNEL_OK")
</pallas_src>

<mosaic_0001>
module attributes {stable_mosaic.version = 11 : i64} {
  func.func @tf_fusion_kernel(%arg0: i32, %arg1: memref<8x128xf32, #tpu.memory_space<vmem>>, %arg2: memref<16x24xf32, #tpu.memory_space<vmem>>, %arg3: memref<16x1xf32, #tpu.memory_space<vmem>>, %arg4: memref<8x16xf32, #tpu.memory_space<vmem>>, %arg5: memref<8x1xf32, #tpu.memory_space<vmem>>, %arg6: memref<8x128xf32, #tpu.memory_space<vmem>>) attributes {dimension_semantics = [#tpu.dimension_semantics<arbitrary>], iteration_bounds = array<i64: 1>, scalar_prefetch = 0 : i64, scratch_operands = 0 : i64, tpu.core_type = #tpu.core_type<tc>, window_params = [{pipeline_mode = #tpu.pipeline_mode<synchronous>, transform_indices = @transform_0, window_bounds = array<i64: 8, 128>}, {pipeline_mode = #tpu.pipeline_mode<synchronous>, transform_indices = @transform_1, window_bounds = array<i64: 16, 24>}, {pipeline_mode = #tpu.pipeline_mode<synchronous>, transform_indices = @transform_2, window_bounds = array<i64: 16, 1>}, {pipeline_mode = #tpu.pipeline_mode<synchronous>, transform_indices = @transform_3, window_bounds = array<i64: 8, 16>}, {pipeline_mode = #tpu.pipeline_mode<synchronous>, transform_indices = @transform_4, window_bounds = array<i64: 8, 1>}, {pipeline_mode = #tpu.pipeline_mode<synchronous>, transform_indices = @transform_5, window_bounds = array<i64: 8, 128>}]} {
    %c0 = arith.constant 0 : index
    %c0_0 = arith.constant 0 : index
    %0 = vector.load %arg1[%c0, %c0_0] : memref<8x128xf32, #tpu.memory_space<vmem>>, vector<8x128xf32>
    %1 = tpu.iota {dimensions = array<i32: 1>} : vector<8x128xi32>
    %cst = arith.constant 0.000000e+00 : f32
    %2 = vector.broadcast %cst : f32 to vector<8x128xf32>
    %c16_i32 = arith.constant 16 : i32
    %c0_i32 = arith.constant 0 : i32
    %3 = arith.cmpi eq, %c16_i32, %c0_i32 : i32
    %c1_i32 = arith.constant 1 : i32
    %4 = arith.select %3, %c1_i32, %c16_i32 : i32
    %5 = vector.broadcast %4 : i32 to vector<8x128xi32>
    %6 = arith.remsi %1, %5 : vector<8x128xi32>
    %c0_i32_1 = arith.constant 0 : i32
    %7 = vector.broadcast %c0_i32_1 : i32 to vector<8x128xi32>
    %8 = arith.cmpi ne, %6, %7 : vector<8x128xi32>
    %c0_i32_2 = arith.constant 0 : i32
    %9 = vector.broadcast %c0_i32_2 : i32 to vector<8x128xi32>
    %10 = arith.cmpi slt, %6, %9 : vector<8x128xi32>
    %c0_i32_3 = arith.constant 0 : i32
    %11 = arith.cmpi slt, %4, %c0_i32_3 : i32
    %12 = vector.broadcast %11 : i1 to vector<8x128xi1>
    %13 = vector.broadcast %12 : vector<8x128xi1> to vector<8x128xi1>
    %14 = arith.xori %10, %13 : vector<8x128xi1>
    %15 = arith.andi %14, %8 : vector<8x128xi1>
    %16 = vector.broadcast %4 : i32 to vector<8x128xi32>
    %17 = arith.addi %6, %16 : vector<8x128xi32>
    %18 = arith.select %15, %17, %6 : vector<8x128xi1>, vector<8x128xi32>
    %c0_i32_4 = arith.constant 0 : i32
    %19 = vector.broadcast %c0_i32_4 : i32 to vector<8x128xi32>
    %20 = arith.cmpi eq, %18, %19 : vector<8x128xi32>
    %c1_i32_5 = arith.constant 1 : i32
    %21 = tpu.dynamic_rotate %0 by %c1_i32_5 dim 1 : vector<8x128xf32>, i32 -> vector<8x128xf32>
    %22 = arith.select %20, %2, %21 : vector<8x128xi1>, vector<8x128xf32>
    %c16_i32_6 = arith.constant 16 : i32
    %c0_i32_7 = arith.constant 0 : i32
    %23 = arith.cmpi eq, %c16_i32_6, %c0_i32_7 : i32
    %c1_i32_8 = arith.constant 1 : i32
    %24 = arith.select %23, %c1_i32_8, %c16_i32_6 : i32
    %25 = vector.broadcast %24 : i32 to vector<8x128xi32>
    %26 = arith.remsi %1, %25 : vector<8x128xi32>
    %c0_i32_9 = arith.constant 0 : i32
    %27 = vector.broadcast %c0_i32_9 : i32 to vector<8x128xi32>
    %28 = arith.cmpi ne, %26, %27 : vector<8x128xi32>
    %c0_i32_10 = arith.constant 0 : i32
    %29 = vector.broadcast %c0_i32_10 : i32 to vector<8x128xi32>
    %30 = arith.cmpi slt, %26, %29 : vector<8x128xi32>
    %c0_i32_11 = arith.constant 0 : i32
    %31 = arith.cmpi slt, %24, %c0_i32_11 : i32
    %32 = vector.broadcast %31 : i1 to vector<8x128xi1>
    %33 = vector.broadcast %32 : vector<8x128xi1> to vector<8x128xi1>
    %34 = arith.xori %30, %33 : vector<8x128xi1>
    %35 = arith.andi %34, %28 : vector<8x128xi1>
    %36 = vector.broadcast %24 : i32 to vector<8x128xi32>
    %37 = arith.addi %26, %36 : vector<8x128xi32>
    %38 = arith.select %35, %37, %26 : vector<8x128xi1>, vector<8x128xi32>
    %c15_i32 = arith.constant 15 : i32
    %39 = vector.broadcast %c15_i32 : i32 to vector<8x128xi32>
    %40 = arith.cmpi eq, %38, %39 : vector<8x128xi32>
    %c127_i32 = arith.constant 127 : i32
    %41 = tpu.dynamic_rotate %0 by %c127_i32 dim 1 : vector<8x128xf32>, i32 -> vector<8x128xf32>
    %42 = arith.select %40, %2, %41 : vector<8x128xi1>, vector<8x128xf32>
    %43 = tpu.concatenate %22, %0, %42 in 0 : vector<8x128xf32>, vector<8x128xf32>, vector<8x128xf32> -> vector<24x128xf32>
    %c0_12 = arith.constant 0 : index
    %c0_13 = arith.constant 0 : index
    %44 = vector.load %arg2[%c0_12, %c0_13] : memref<16x24xf32, #tpu.memory_space<vmem>>, vector<16x24xf32>
    %cst_14 = arith.constant dense<0.000000e+00> : vector<16x128xf32>
    %45 = tpu.matmul %44, %43, %cst_14 {dimension_numbers = #tpu.dot_dimension_numbers<[1], [0], [0], [1], [0, 0, 1, 1], [], []>} : vector<16x24xf32>, vector<24x128xf32>, vector<16x128xf32> -> vector<16x128xf32>
    %c0_15 = arith.constant 0 : index
    %c0_16 = arith.constant 0 : index
    %46 = vector.load %arg3[%c0_15, %c0_16] : memref<16x1xf32, #tpu.memory_space<vmem>>, vector<16x1xf32>
    %47 = vector.broadcast %46 : vector<16x1xf32> to vector<16x128xf32>
    %48 = arith.addf %45, %47 : vector<16x128xf32>
    %cst_17 = arith.constant 0.000000e+00 : f32
    %49 = vector.broadcast %cst_17 : f32 to vector<16x128xf32>
    %50 = arith.maximumf %48, %49 : vector<16x128xf32>
    %c0_18 = arith.constant 0 : index
    %c0_19 = arith.constant 0 : index
    %51 = vector.load %arg4[%c0_18, %c0_19] : memref<8x16xf32, #tpu.memory_space<vmem>>, vector<8x16xf32>
    %cst_20 = arith.constant dense<0.000000e+00> : vector<8x128xf32>
    %52 = tpu.matmul %51, %50, %cst_20 {dimension_numbers = #tpu.dot_dimension_numbers<[1], [0], [0], [1], [0, 0, 1, 1], [], []>} : vector<8x16xf32>, vector<16x128xf32>, vector<8x128xf32> -> vector<8x128xf32>
    %c0_21 = arith.constant 0 : index
    %c0_22 = arith.constant 0 : index
    %53 = vector.load %arg5[%c0_21, %c0_22] : memref<8x1xf32, #tpu.memory_space<vmem>>, vector<8x1xf32>
    %54 = vector.broadcast %53 : vector<8x1xf32> to vector<8x128xf32>
    %55 = arith.addf %52, %54 : vector<8x128xf32>
    %cst_23 = arith.constant 0.000000e+00 : f32
    %56 = vector.broadcast %cst_23 : f32 to vector<8x128xf32>
    %57 = arith.maximumf %55, %56 : vector<8x128xf32>
    %c0_24 = arith.constant 0 : index
    %c0_25 = arith.constant 0 : index
    %58 = vector.load %arg6[%c0_24, %c0_25] : memref<8x128xf32, #tpu.memory_space<vmem>>, vector<8x128xf32>
    tpu.vector_store %arg6[%c0_24, %c0_25], %57 {strides = array<i32>} : memref<8x128xf32, #tpu.memory_space<vmem>>, vector<8x128xf32>,
    return
  }
  func.func @transform_0(%arg0: i32) -> (i32, i32) {
    %c0_i32 = arith.constant 0 : i32
    %c0_i32_0 = arith.constant 0 : i32
    %c0_i32_1 = arith.constant 0 : i32
    return %c0_i32, %c0_i32_0 : i32, i32
  }
  func.func @transform_1(%arg0: i32) -> (i32, i32) {
    %c0_i32 = arith.constant 0 : i32
    %c0_i32_0 = arith.constant 0 : i32
    %c0_i32_1 = arith.constant 0 : i32
    return %c0_i32, %c0_i32_0 : i32, i32
  }
  func.func @transform_2(%arg0: i32) -> (i32, i32) {
    %c0_i32 = arith.constant 0 : i32
    %c0_i32_0 = arith.constant 0 : i32
    %c0_i32_1 = arith.constant 0 : i32
    return %c0_i32, %c0_i32_0 : i32, i32
  }
  func.func @transform_3(%arg0: i32) -> (i32, i32) {
    %c0_i32 = arith.constant 0 : i32
    %c0_i32_0 = arith.constant 0 : i32
    %c0_i32_1 = arith.constant 0 : i32
    return %c0_i32, %c0_i32_0 : i32, i32
  }
  func.func @transform_4(%arg0: i32) -> (i32, i32) {
    %c0_i32 = arith.constant 0 : i32
    %c0_i32_0 = arith.constant 0 : i32
    %c0_i32_1 = arith.constant 0 : i32
    return %c0_i32, %c0_i32_0 : i32, i32
  }
  func.func @transform_5(%arg0: i32) -> (i32, i32) {
    %c0_i32 = arith.constant 0 : i32
    %c0_i32_0 = arith.constant 0 : i32
    %c0_i32_1 = arith.constant 0 : i32
    return %c0_i32, %c0_i32_0 : i32, i32
  }
}

</mosaic_0001>

<bundles_post_ra>
// kernel: tpu_custom_call.1
= control target key start
LH: loop header
LB: loop body
LE: loop exit
PB: predicated region body
PF: predicated region fallthrough
CT: control target
= control target key end

     0   :  { %10 = vsyncpa [#allocation3], 0  ;;  %s401_s0 = inlined_call_operand.vmem [shape: f32[8,128], index: 0, kind: input, shape index: {}]   ;;  %s402_s1 = inlined_call_operand.vmem [shape: f32[16,24], index: 1, kind: input, shape index: {}]   ;;  %s403_s2 = inlined_call_operand.vmem [shape: f32[16,1], index: 2, kind: input, shape index: {}]   ;;  %s404_s3 = inlined_call_operand.hbm [shape: f32[8,16], index: 3, kind: input, shape index: {}]   ;;  %s405_s4 = inlined_call_operand.vmem [shape: f32[8,1], index: 4, kind: input, shape index: {}]   ;;  %s406_s5 = inlined_call_operand.hbm [shape: f32[8,128], index: 5, kind: output, shape index: {}]  }
   0x1   :  { %11 = vsyncpa [#allocation4], 0  ;;  %s338_s18 = smov [#allocation2]  }
   0x2   :  { %s24_s19 = sshll.u32 %s338_s18, 4  ;;  %s25_s19 = int_to_ptr.vmem [resolvable:$true] %s24_s19 }
   0x3   :  { %s302_s20 = scalar_lea.vmem %s25_s19, 128  ;;  %p307_p1 = scmp.lt.s32.totalorder %s25_s19, %s25_s19 }
   0x4   :  { %p303_p0 = scmp.ne.s32.totalorder %s25_s19, %s302_s20  ;;  %p308_p2 = scmp.lt.s32.totalorder %s302_s20, %s302_s20 }
   0x6   :  { %p309_p3 = por %p308_p2, %p307_p1 }
   0x8   :  { %p310_p4 = pnand %p309_p3, %p303_p0 }
   0xa   :  { %313 = shalt.err (!%p310_p4)
}
   0xb   :  { %27 = dma.hbm_to_vmem [thread:$0]  %s404_s3, 128, %s25_s19, [#allocation3]  }
   0xc   :  { %334 = dma.done.wait [#allocation3], 128  }
   0xd   :  { %335 = vsyncadd [#allocation3], 4294967168  ;;  %v339_v0 = vmov 0   ;;  %vm70_vm0 = vcmask 195584   ;;  %v33_v1 = vld [vmem:[%s401_s0] sm:$0xff]  ;;  %s340_s27 = smov 127   ;;  %v34_v5 = vlaneseq }
   0xe   :  { %292 = vset.pattern.permute.xlu1 %v339_v0  ;;  %293 = vset.pattern.permute.xlu0 %v339_v0  ;;  %v56_v2 = vld [vmem:[%s402_s1] sm:$0xff]  ;;  %v59_v3 = vld [vmem:[%s403_s2 + $0x8] sm:$0xff]  ;;  %s341_s6 = smov 1   ;;  %v342_v11 = vmov 0.0   ;;  %vm343_vm3 = vmmov 0   ;;  %vm161_vm4 = vcmask 130048  }
   0xf   :  { %53 = vrot.lane.b32.xlu0 %v33_v1, %s340_s27  ;;  %275 = vmatprep.mubr.msk.f32.mxu0 %vm70_vm0, %v56_v2  ;;  %v58_v4 = vld [vmem:[%s403_s2] sm:$0xff]  ;;  %v35_v6 = vand.u32 127, %v34_v5  ;;  %v57_v10 = vld [vmem:[%s402_s1 + $0x8] sm:$0xff]  ;;  %s344_s1 = smov [#allocation5]  }
  0x10   :  { %67 = vperm.xlu1 %292, %v59_v3   ;;  %278 = vmatprep.subr.mxu1 %v342_v11  ;;  %v155_v12 = vld [vmem:[%s405_s4] sm:$0xff]  ;;  %s243_s9 = sshll.u32 %s344_s1, 4  ;;  %s244_s9 = int_to_ptr.vmem [resolvable:$true] %s243_s9 }
  0x11   :  { %v40_v7 = vand.u32 15, %v35_v6  ;;  %282 = vmatprep.mubr.msk.f32.mxu1 %vm343_vm3, %v342_v11  ;;  %v154_v21 = vld [vmem:[#allocation2] sm:$0xff]  ;;  %s314_s4 = scalar_lea.vmem %s244_s9, 128  ;;  %p319_p6 = scmp.lt.s32.totalorder %s244_s9, %s244_s9 }
  0x12   :  { %p315_p5 = scmp.ne.s32.totalorder %s244_s9, %s314_s4  ;;  %p320_p7 = scmp.lt.s32.totalorder %s314_s4, %s314_s4 }
  0x13   :  { %49 = vrot.lane.b32.xlu0 %v33_v1, %s341_s6  ;;  %vm259_vm1 = vcmp.ne.s32.totalorder %v40_v7, 15  ;;  %vm260_vm2 = vcmp.ne.s32.totalorder %v40_v7, 0 }
  0x14   :  { %62 = vperm.xlu1 %292, %v58_v4   ;;  %p321_p8 = por %p320_p7, %p319_p6 }
  0x16   :  { %p322_p9 = pnand %p321_p8, %p315_p5 }
  0x17   :  { %158 = vperm.xlu0 %293, %v155_v12  }
  0x81   :  { %v54_v8 = vpop.permute.xlu0 %53 }
  0x82   :  { %269 = vmatprep.subr.msk.mxu0 %vm259_vm1, %v54_v8 }
  0x83   :  { %270 = vmatpush3.msk.msra.mxu0 %vm259_vm1, %v54_v8 }
  0x84   :  { %271 = vmatprep.subr.mxu0 %v33_v1 }
  0x85   :  { %272 = vmatpush3.msra.mxu0 %v33_v1  ;;  %v50_v9 = vpop.permute.xlu0 %49 }
  0x86   :  { %273 = vmatprep.subr.msk.mxu0 %vm260_vm2, %v50_v9 }
  0x87   :  { %274 = vmatpush3.msk.msra.mxu0 %vm260_vm2, %v50_v9 }
  0x88   :  { %276 = vmatmul.mubr.msk.f32.vlgmr.msra.gmra.mxu0 %vm70_vm0, %v57_v10 }
  0x8b   :  { %v68_v13 = vpop.permute.xlu1 %67 }
  0x8f   :  { %v63_v16 = vpop.permute.xlu1 %62 }
  0x92   :  { %v159_v22 = vpop.permute.xlu0 %158 }
 0x148   :  { %v277_v14 = vpop.f32.mrf.mxu0 }
 0x149   :  { %v149_v15 = vadd.f32 %v277_v14, %v68_v13 }
 0x14a   :  { %v143_v17 = vpop.f32.mrf.mxu0 }
 0x14b   :  { %v153_v18 = vmax.f32 %v149_v15, 0.0  ;;  %v144_v19 = vadd.f32 %v143_v17, %v63_v16 }
 0x14d   :  { %v152_v20 = vmax.f32 %v144_v19, 0.0  ;;  %279 = vmatpush3.msra.mxu1 %v153_v18 }
 0x14e   :  { %280 = vmatprep.subr.mxu1 %v342_v11 }
 0x14f   :  { %281 = vmatpush3.msra.mxu1 %v152_v20 }
 0x150   :  { %283 = vmatmul.mubr.msk.f32.vlgmr.msra.gmra.mxu1 %vm161_vm4, %v154_v21 }
 0x210   :  { %v231_v23 = vpop.f32.mrf.mxu1 }
 0x211   :  { %v232_v24 = vadd.f32 %v231_v23, %v159_v22 }
 0x212   :  { %v284_v25 = vpop.f32.mrf.mxu1 }
 0x213   :  { %v235_v26 = vmax.f32 %v232_v24, 0.0 }
 0x215   :  { %236 = vst [vmem:[#allocation5] sm:$0xff] %v235_v26 }
 0x216   :  { %325 = shalt.err (!%p322_p9)
}
 0x217   :  { %246 = dma.vmem_to_hbm [thread:$0]  %s244_s9, 128, %s406_s5, [#allocation4]  }
 0x218   :  { %336 = dma.done.wait [#allocation4], 128  }
 0x219   :  { %337 = vsyncadd [#allocation4], 4294967168 }
 0x21a   :  { %250 = vsyncpa [#allocation3], 1 }
 0x21b   :  { %251 = vsyncpa [#allocation4], 1 }

</bundles_post_ra>
